<compile_context>
chip_gen: v7x
topology: tpu7x:2x2x1
jax: 0.10.0
libtpu: 0.0.40
codegen_flags: <defaults>
</compile_context>

<pallas_src>
import functools
import math

import jax
import jax.numpy as jnp
from jax.experimental import pallas as pl
from jax.experimental.pallas import tpu as pltpu


def _round_up(v, m):
    return ((v + m - 1) // m) * m


# ----------------------------- Pallas kernel --------------------------------

def label_smoothing_kernel(t_ref, x_ref, out_ref, *, confidence, smooth_val,
                           row_const, padding_idx, valid_cols, mask_cols):
    j = pl.program_id(1)                      # vocab tile index (reduction, last)

    @pl.when(j == 0)
    def _init():
        out_ref[...] = jnp.zeros_like(out_ref)

    x = x_ref[...].astype(jnp.float32)        # (TM, TV); bf16 inputs upcast once
    tgt = t_ref[...]                          # (TM, 1) int32 targets
    tm, tv = x.shape

    lane = jax.lax.broadcasted_iota(jnp.int32, (tm, tv), 1)   # local column id
    tgt_local = tgt - j * tv                  # target column in tile coordinates

    # sum(td * x) built on the fly: smooth everywhere, confidence at the target.
    coef = jnp.where(lane == tgt_local, confidence, smooth_val)
    contrib = coef * x
    if mask_cols:                             # ragged final vocab tile only
        contrib = jnp.where(lane < valid_cols - j * tv, contrib, 0.0)
    out_ref[...] += jnp.sum(contrib, axis=-1, keepdims=True)

    # padding-column correction: only the one tile containing padding_idx.
    pad_local = padding_idx - j * tv

    @pl.when((pad_local >= 0) & (pad_local < tv))
    def _pad_col():
        x_pad = jnp.sum(jnp.where(lane == pad_local, x, 0.0),
                        axis=-1, keepdims=True)
        out_ref[...] -= smooth_val * x_pad

    @pl.when(j == pl.num_programs(1) - 1)
    def _finalize():
        valid = tgt != padding_idx            # rows whose target is padding -> 0
        out_ref[...] = jnp.where(valid, row_const - out_ref[...], 0.0)


# ----------------------------- wrapper ---------------------------------------

def label_smoothing_loss(x, target, *, size, padding_idx, smoothing,
                         row_tile=512, col_tile=4096):
    """x: (N, size) float32/bfloat16 log-probabilities; target: (N,) int ids."""
    N, V = x.shape
    assert V == size, "x.shape[1] must equal size (matches the torch assert)"
    itemsize = jnp.dtype(x.dtype).itemsize

    # Lane-dense / sublane-aligned tiles, never larger than the rounded-up dims.
    tm = min(row_tile, _round_up(N, 8))
    tm = max(8, (tm // 8) * 8)
    tv = min(col_tile, _round_up(V, 128))
    tv = max(128, (tv // 128) * 128)

    # Cap the double-buffered x window (v7x has only 64 MiB physical VMEM/TC).
    MAX_X_WINDOW = 24 << 20
    while 2 * tm * tv * itemsize > MAX_X_WINDOW and tv > 128:
        tv = max(128, ((tv // 2) // 128) * 128)
    while 2 * tm * tv * itemsize > MAX_X_WINDOW and tm > 8:
        tm = max(8, ((tm // 2) // 8) * 8)

    grid_rows = pl.cdiv(N, tm)
    grid_cols = pl.cdiv(V, tv)
    mask_cols = (V % tv) != 0                 # ragged last vocab tile

    confidence = 1.0 - smoothing
    smooth_val = smoothing / (size - 2)
    row_const = 0.0                           # sum(td*log td) for a non-pad row
    if confidence > 0.0:
        row_const += confidence * math.log(confidence)
    if smooth_val > 0.0:
        row_const += (size - 2) * smooth_val * math.log(smooth_val)

    # Pad targets so out-of-range row tiles behave like padding rows (zeroed).
    n_pad_rows = grid_rows * tm
    t2d = target.astype(jnp.int32).reshape(N, 1)
    if n_pad_rows != N:
        t2d = jnp.pad(t2d, ((0, n_pad_rows - N), (0, 0)),
                      constant_values=int(padding_idx))

    kernel = functools.partial(
        label_smoothing_kernel,
        confidence=float(confidence), smooth_val=float(smooth_val),
        row_const=float(row_const), padding_idx=int(padding_idx),
        valid_cols=int(V), mask_cols=bool(mask_cols))

    vmem_limit = int(2 * tm * tv * itemsize + (8 << 20))
    vmem_limit = max(16 << 20, min(vmem_limit, 64 << 20))

    partials = pl.pallas_call(
        kernel,
        out_shape=jax.ShapeDtypeStruct((n_pad_rows, 1), jnp.float32),
        grid=(grid_rows, grid_cols),
        in_specs=[
            pl.BlockSpec((tm, 1), lambda i, j: (i, 0)),    # target column
            pl.BlockSpec((tm, tv), lambda i, j: (i, j)),   # x tile
        ],
        # per-row losses stay VMEM-resident across the whole vocab sweep
        out_specs=pl.BlockSpec((tm, 1), lambda i, j: (i, 0)),
        compiler_params=pltpu.CompilerParams(
            dimension_semantics=("parallel", "arbitrary"),
            vmem_limit_bytes=vmem_limit),
    )(t2d, x)
    return jnp.sum(partials)


# ----------------------------- pure-JAX reference ----------------------------

def _reference_loss(x, target, size, padding_idx, smoothing):
    conf = 1.0 - smoothing
    sm = smoothing / (size - 2)
    n = x.shape[0]
    td = jnp.full(x.shape, sm, jnp.float32)
    td = td.at[jnp.arange(n), target].set(conf)
    td = td.at[:, padding_idx].set(0.0)
    td = jnp.where((target == padding_idx)[:, None], 0.0, td)
    return jnp.sum(jnp.where(td > 0.0, td * (jnp.log(td) - x.astype(jnp.float32)), 0.0))


# ----------------------------------- main ------------------------------------

if __name__ == "__main__":
    PAD, SMOOTH = 0, 0.1
    key = jax.random.PRNGKey(0)
    k1, k2, k3, k4 = jax.random.split(key, 4)

    # --- test 1: clean lane-aligned shapes (batch=2, seq=8 -> 16 rows, vocab=512)
    N, V = 16, 512
    logits = jax.random.normal(k1, (N, V), jnp.float32)
    x = jax.nn.log_softmax(logits, axis=-1)          # KLDivLoss expects log-probs
    target = jax.random.randint(k2, (N,), 1, V, dtype=jnp.int32)
    target = target.at[-3:].set(PAD)                 # exercise padding-row zeroing

    loss = label_smoothing_loss(x, target, size=V, padding_idx=PAD,
                                smoothing=SMOOTH)
    loss = jax.block_until_ready(loss)
    assert loss.shape == () and loss.dtype == jnp.float32
    assert bool(jnp.isfinite(loss))
    ref = _reference_loss(x, target, V, PAD, SMOOTH)
    assert bool(jnp.abs(loss - ref) <= 1e-3 + 1e-4 * jnp.abs(ref)), (
        float(loss), float(ref))

    # --- test 2: ragged shapes (rows not /8, vocab not /128) -> masked path
    N2, V2 = 20, 200
    logits2 = jax.random.normal(k3, (N2, V2), jnp.float32)
    x2 = jax.nn.log_softmax(logits2, axis=-1)
    target2 = jax.random.randint(k4, (N2,), 1, V2, dtype=jnp.int32)
    target2 = target2.at[:2].set(PAD)

    loss2 = label_smoothing_loss(x2, target2, size=V2, padding_idx=PAD,
                                 smoothing=SMOOTH)
    loss2 = jax.block_until_ready(loss2)
    assert bool(jnp.isfinite(loss2))
    ref2 = _reference_loss(x2, target2, V2, PAD, SMOOTH)
    assert bool(jnp.abs(loss2 - ref2) <= 1e-3 + 1e-4 * jnp.abs(ref2)), (
        float(loss2), float(ref2))

    print("KERNEL_OK")
</pallas_src>

<mosaic_0001>
module attributes {stable_mosaic.version = 11 : i64} {
  func.func @label_smoothing_kernel(%arg0: i32, %arg1: i32, %arg2: memref<16x1xi32, #tpu.memory_space<vmem>>, %arg3: memref<16x512xf32, #tpu.memory_space<vmem>>, %arg4: memref<16x1xf32, #tpu.memory_space<vmem>>) attributes {dimension_semantics = [#tpu.dimension_semantics<parallel>, #tpu.dimension_semantics<arbitrary>], iteration_bounds = array<i64: 1, 1>, scalar_prefetch = 0 : i64, scratch_operands = 0 : i64, tpu.core_type = #tpu.core_type<tc>, window_params = [{transform_indices = @transform_0, window_bounds = array<i64: 16, 1>}, {transform_indices = @transform_1, window_bounds = array<i64: 16, 512>}, {transform_indices = @transform_2, window_bounds = array<i64: 16, 1>}]} {
    %c0_i32 = arith.constant 0 : i32
    %0 = arith.cmpi eq, %arg1, %c0_i32 : i32
    %1 = arith.extui %0 : i1 to i32
    %c0_i32_0 = arith.constant 0 : i32
    %2 = arith.cmpi ne, %1, %c0_i32_0 : i32
    scf.if %2 {
      %cst_17 = arith.constant 0.000000e+00 : f32
      %30 = vector.broadcast %cst_17 : f32 to vector<16x1xf32>
      %c0_18 = arith.constant 0 : index
      %c0_19 = arith.constant 0 : index
      %31 = vector.load %arg4[%c0_18, %c0_19] : memref<16x1xf32, #tpu.memory_space<vmem>>, vector<16x1xf32>
      tpu.vector_store %arg4[%c0_18, %c0_19], %30 {strides = array<i32>} : memref<16x1xf32, #tpu.memory_space<vmem>>, vector<16x1xf32>,
    } else {
    }
    %c0 = arith.constant 0 : index
    %c0_1 = arith.constant 0 : index
    %3 = vector.load %arg3[%c0, %c0_1] : memref<16x512xf32, #tpu.memory_space<vmem>>, vector<16x512xf32>
    %c0_2 = arith.constant 0 : index
    %c0_3 = arith.constant 0 : index
    %4 = vector.load %arg2[%c0_2, %c0_3] : memref<16x1xi32, #tpu.memory_space<vmem>>, vector<16x1xi32>
    %5 = tpu.iota {dimensions = array<i32: 1>} : vector<16x512xi32>
    %c512_i32 = arith.constant 512 : i32
    %6 = arith.muli %arg1, %c512_i32 : i32
    %7 = vector.broadcast %6 : i32 to vector<16x1xi32>
    %8 = arith.subi %4, %7 : vector<16x1xi32>
    %9 = vector.broadcast %8 : vector<16x1xi32> to vector<16x512xi32>
    %10 = arith.cmpi eq, %5, %9 : vector<16x512xi32>
    %cst = arith.constant 0.899999976 : f32
    %cst_4 = arith.constant 1.96078428E-4 : f32
    %11 = vector.broadcast %cst : f32 to vector<16x512xf32>
    %12 = vector.broadcast %cst_4 : f32 to vector<16x512xf32>
    %13 = arith.select %10, %11, %12 : vector<16x512xi1>, vector<16x512xf32>
    %14 = arith.mulf %13, %3 : vector<16x512xf32>
    %c0_5 = arith.constant 0 : index
    %c0_6 = arith.constant 0 : index
    %15 = vector.load %arg4[%c0_5, %c0_6] : memref<16x1xf32, #tpu.memory_space<vmem>>, vector<16x1xf32>
    %cst_7 = arith.constant dense<0.000000e+00> : vector<16xf32>
    %16 = vector.multi_reduction <add>, %14, %cst_7 [1] : vector<16x512xf32> to vector<16xf32>
    %17 = vector.shape_cast %16 : vector<16xf32> to vector<16x1xf32>
    %18 = arith.addf %15, %17 : vector<16x1xf32>
    %c0_8 = arith.constant 0 : index
    %c0_9 = arith.constant 0 : index
    %19 = vector.load %arg4[%c0_8, %c0_9] : memref<16x1xf32, #tpu.memory_space<vmem>>, vector<16x1xf32>
    tpu.vector_store %arg4[%c0_8, %c0_9], %18 {strides = array<i32>} : memref<16x1xf32, #tpu.memory_space<vmem>>, vector<16x1xf32>,
    %c512_i32_10 = arith.constant 512 : i32
    %20 = arith.muli %arg1, %c512_i32_10 : i32
    %c0_i32_11 = arith.constant 0 : i32
    %21 = arith.subi %c0_i32_11, %20 : i32
    %c0_i32_12 = arith.constant 0 : i32
    %22 = arith.cmpi sge, %21, %c0_i32_12 : i32
    %c512_i32_13 = arith.constant 512 : i32
    %23 = arith.cmpi slt, %21, %c512_i32_13 : i32
    %24 = arith.andi %22, %23 : i1
    %25 = arith.extui %24 : i1 to i32
    %c0_i32_14 = arith.constant 0 : i32
    %26 = arith.cmpi ne, %25, %c0_i32_14 : i32
    scf.if %26 {
      %30 = vector.broadcast %21 : i32 to vector<16x512xi32>
      %31 = arith.cmpi eq, %5, %30 : vector<16x512xi32>
      %cst_17 = arith.constant 0.000000e+00 : f32
      %32 = vector.broadcast %cst_17 : f32 to vector<16x512xf32>
      %33 = arith.select %31, %3, %32 : vector<16x512xi1>, vector<16x512xf32>
      %cst_18 = arith.constant dense<0.000000e+00> : vector<16xf32>
      %34 = vector.multi_reduction <add>, %33, %cst_18 [1] : vector<16x512xf32> to vector<16xf32>
      %35 = vector.shape_cast %34 : vector<16xf32> to vector<16x1xf32>
      %c0_19 = arith.constant 0 : index
      %c0_20 = arith.constant 0 : index
      %36 = vector.load %arg4[%c0_19, %c0_20] : memref<16x1xf32, #tpu.memory_space<vmem>>, vector<16x1xf32>
      %cst_21 = arith.constant 1.96078428E-4 : f32
      %37 = vector.broadcast %cst_21 : f32 to vector<16x1xf32>
      %38 = arith.mulf %37, %35 : vector<16x1xf32>
      %39 = arith.subf %36, %38 : vector<16x1xf32>
      %c0_22 = arith.constant 0 : index
      %c0_23 = arith.constant 0 : index
      %40 = vector.load %arg4[%c0_22, %c0_23] : memref<16x1xf32, #tpu.memory_space<vmem>>, vector<16x1xf32>
      tpu.vector_store %arg4[%c0_22, %c0_23], %39 {strides = array<i32>} : memref<16x1xf32, #tpu.memory_space<vmem>>, vector<16x1xf32>,
    } else {
    }
    %c0_i32_15 = arith.constant 0 : i32
    %27 = arith.cmpi eq, %arg1, %c0_i32_15 : i32
    %28 = arith.extui %27 : i1 to i32
    %c0_i32_16 = arith.constant 0 : i32
    %29 = arith.cmpi ne, %28, %c0_i32_16 : i32
    scf.if %29 {
      %c0_i32_17 = arith.constant 0 : i32
      %30 = vector.broadcast %c0_i32_17 : i32 to vector<16x1xi32>
      %31 = arith.cmpi ne, %4, %30 : vector<16x1xi32>
      %c0_18 = arith.constant 0 : index
      %c0_19 = arith.constant 0 : index
      %32 = vector.load %arg4[%c0_18, %c0_19] : memref<16x1xf32, #tpu.memory_space<vmem>>, vector<16x1xf32>
      %cst_20 = arith.constant -0.948524057 : f32
      %33 = vector.broadcast %cst_20 : f32 to vector<16x1xf32>
      %34 = arith.subf %33, %32 : vector<16x1xf32>
      %cst_21 = arith.constant 0.000000e+00 : f32
      %35 = vector.broadcast %cst_21 : f32 to vector<16x1xf32>
      %36 = arith.select %31, %34, %35 : vector<16x1xi1>, vector<16x1xf32>
      %c0_22 = arith.constant 0 : index
      %c0_23 = arith.constant 0 : index
      %37 = vector.load %arg4[%c0_22, %c0_23] : memref<16x1xf32, #tpu.memory_space<vmem>>, vector<16x1xf32>
      tpu.vector_store %arg4[%c0_22, %c0_23], %36 {strides = array<i32>} : memref<16x1xf32, #tpu.memory_space<vmem>>, vector<16x1xf32>,
    } else {
    }
    return
  }
  func.func @transform_0(%arg0: i32, %arg1: i32) -> (i32, i32) {
    %c0_i32 = arith.constant 0 : i32
    %c0_i32_0 = arith.constant 0 : i32
    return %arg0, %c0_i32 : i32, i32
  }
  func.func @transform_1(%arg0: i32, %arg1: i32) -> (i32, i32) {
    %c0_i32 = arith.constant 0 : i32
    return %arg0, %arg1 : i32, i32
  }
  func.func @transform_2(%arg0: i32, %arg1: i32) -> (i32, i32) {
    %c0_i32 = arith.constant 0 : i32
    %c0_i32_0 = arith.constant 0 : i32
    return %arg0, %c0_i32 : i32, i32
  }
}

</mosaic_0001>

<bundles_post_ra>
// kernel: tpu_custom_call.1
= control target key start
LH: loop header
LB: loop body
LE: loop exit
PB: predicated region body
PF: predicated region fallthrough
CT: control target
= control target key end

     0   :  { %7 = vsyncpa [#allocation3], 0  ;;  %s185_s9 = smov [#allocation2]   ;;  %s284_s0 = inlined_call_operand.vmem [shape: s32[16,1], index: 0, kind: input, shape index: {}]   ;;  %s285_s1 = inlined_call_operand.hbm [shape: f32[16,512], index: 1, kind: input, shape index: {}]   ;;  %s286_s2 = inlined_call_operand.vmem [shape: f32[16,1], index: 2, kind: output, shape index: {}]  }
   0x1   :  { %s15_s10 = sshll.u32 %s185_s9, 4  ;;  %s161_s13 = scalar_lea.hbm %s285_s1, 1024  ;;  %s16_s10 = int_to_ptr.vmem [resolvable:$true] %s15_s10 }
   0x2   :  { %p162_p0 = scmp.ne.s32.totalorder %s285_s1, %s161_s13  ;;  %p165_p1 = scmp.lt.u32.totalorder %s161_s13, %s285_s1 }
   0x4   :  { %p167_p2 = pnand %p165_p1, %p162_p0 }
   0x6   :  { %170 = shalt.err (!%p167_p2)
}
   0x7   :  { %s171_s18 = scalar_lea.vmem %s16_s10, 1024  ;;  %p176_p4 = scmp.lt.s32.totalorder %s16_s10, %s16_s10 }
   0x8   :  { %p172_p3 = scmp.ne.s32.totalorder %s16_s10, %s171_s18  ;;  %p177_p5 = scmp.lt.s32.totalorder %s171_s18, %s171_s18 }
   0xa   :  { %p178_p6 = por %p177_p5, %p176_p4 }
   0xc   :  { %p179_p7 = pnand %p178_p6, %p172_p3 }
   0xe   :  { %182 = shalt.err (!%p179_p7)
}
   0xf   :  { %s186_s19 = smov 512   ;;  %s187_s20 = smov 32  }
  0x10   :  { %21 = dma.hbm_to_vmem [thread:$0]  %s285_s1, 1024, %s16_s10, [#allocation3], %s186_s19, %s186_s19, %s187_s20  }
  0x11   :  { %183 = dma.done.wait [#allocation3], 1024  }
  0x12   :  { %184 = vsyncadd [#allocation3], 4294966272  ;;  %v188_v0 = vmov 0   ;;  %v221_v1 = vld [vmem:[%s284_s0] sm:$0xff]  ;;  %v227_v2 = vld [vmem:[%s284_s0 + $0x8] sm:$0xff]  ;;  %vm29_vm0 = vcmask 7168   ;;  %v42_v4 = vlaneseq }
  0x13   :  { %160 = vset.pattern.permute.xlu0 %v188_v0  ;;  %v189_v3 = vmov 0.0   ;;  %v32_v6 = vld [vmem:[#allocation2] sm:$0xff]  ;;  %v33_v12 = vld [vmem:[#allocation2 + $0x8] sm:$0xff]  ;;  %v34_v13 = vld [vmem:[#allocation2 + $0x10] sm:$0xff]  ;;  %v190_v14 = vmov 0.00019607843  }
  0x14   :  { %52 = vperm.xlu0 %160, %v221_v1   ;;  %30 = vst.msk [vmem:[%s286_s2] sm:$0xff] %vm29_vm0, %v189_v3  ;;  %31 = vst.msk [vmem:[%s286_s2 + $0x8] sm:$0xff] %vm29_vm0, %v189_v3  ;;  %v43_v5 = vand.u32 127, %v42_v4  ;;  %v35_v21 = vld [vmem:[#allocation2 + $0x18] sm:$0xff]  ;;  %v36_v24 = vld [vmem:[#allocation2 + $0x20] sm:$0xff]  ;;  %vm139_vm10 = vcmp.ne.s32.totalorder %v221_v1, 0 }
  0x15   :  { %v37_v25 = vld [vmem:[#allocation2 + $0x28] sm:$0xff]  ;;  %v38_v27 = vld [vmem:[#allocation2 + $0x30] sm:$0xff]  ;;  %v39_v35 = vld [vmem:[#allocation2 + $0x38] sm:$0xff]  ;;  %vm140_vm11 = vcmp.ne.s32.totalorder %v227_v2, 0 }
  0x16   :  { %vm106_vm1 = vcmp.eq.s32.totalorder %v43_v5, 0  ;;  %v44_v8 = vadd.s32 128, %v43_v5  ;;  %v45_v9 = vadd.s32 256, %v43_v5  ;;  %v46_v10 = vadd.s32 384, %v43_v5 }
  0x17   :  { %v110_v7 = vsel %vm106_vm1, %v32_v6, 0.0  ;;  %v114_v43 = vsel %vm106_vm1, %v36_v24, 0.0 }
  0x18   :  { %55 = vperm.xlu0 %160, %v227_v2  }
  0x1b   :  { %v81_v44 = vld [vmem:[%s286_s2] sm:$0xff]  ;;  %v82_v47 = vld [vmem:[%s286_s2 + $0x8] sm:$0xff] }
  0x37   :  { %121 = vadd.xlane.f32.xlu0 %v110_v7 }
  0x93   :  { %v53_v11 = vpop.permute.xlu0 %52 }
  0x94   :  { %vm57_vm2 = vcmp.eq.s32.totalorder %v43_v5, %v53_v11  ;;  %vm58_vm3 = vcmp.eq.s32.totalorder %v44_v8, %v53_v11  ;;  %vm59_vm4 = vcmp.eq.s32.totalorder %v45_v9, %v53_v11  ;;  %vm60_vm5 = vcmp.eq.s32.totalorder %v46_v10, %v53_v11 }
  0x95   :  { %v65_v15 = vsel %vm57_vm2, 0.9, %v190_v14  ;;  %v66_v16 = vsel %vm58_vm3, 0.9, %v190_v14  ;;  %v67_v17 = vsel %vm59_vm4, 0.9, %v190_v14 }
  0x96   :  { %v73_v18 = vmul.f32 %v65_v15, %v32_v6  ;;  %v74_v19 = vmul.f32 %v66_v16, %v33_v12  ;;  %v68_v22 = vsel %vm60_vm5, 0.9, %v190_v14  ;;  %v75_v23 = vmul.f32 %v67_v17, %v34_v13 }
  0x97   :  { %v56_v20 = vpop.permute.xlu0 %55  ;;  %v76_v31 = vmul.f32 %v68_v22, %v35_v21 }
  0x98   :  { %vm61_vm6 = vcmp.eq.s32.totalorder %v43_v5, %v56_v20  ;;  %vm62_vm7 = vcmp.eq.s32.totalorder %v44_v8, %v56_v20  ;;  %vm63_vm8 = vcmp.eq.s32.totalorder %v45_v9, %v56_v20  ;;  %v83_v26 = vadd.f32 %v74_v19, %v73_v18 }
  0x99   :  { %v69_v28 = vsel %vm61_vm6, 0.9, %v190_v14  ;;  %v70_v29 = vsel %vm62_vm7, 0.9, %v190_v14  ;;  %vm64_vm9 = vcmp.eq.s32.totalorder %v46_v10, %v56_v20  ;;  %v71_v30 = vsel %vm63_vm8, 0.9, %v190_v14 }
  0x9a   :  { %v84_v32 = vadd.f32 %v83_v26, %v75_v23  ;;  %v77_v33 = vmul.f32 %v69_v28, %v36_v24  ;;  %v78_v34 = vmul.f32 %v70_v29, %v37_v25  ;;  %v72_v36 = vsel %vm64_vm9, 0.9, %v190_v14 }
  0x9b   :  { %v79_v38 = vmul.f32 %v71_v30, %v38_v27  ;;  %v80_v40 = vmul.f32 %v72_v36, %v39_v35 }
  0x9c   :  { %v85_v37 = vadd.f32 %v84_v32, %v76_v31  ;;  %v88_v39 = vadd.f32 %v78_v34, %v77_v33 }
  0x9e   :  { %86 = vadd.xlane.f32.xlu1 %v85_v37  ;;  %v89_v41 = vadd.f32 %v88_v39, %v79_v38 }
  0xa0   :  { %v90_v42 = vadd.f32 %v89_v41, %v80_v40 }
  0xa2   :  { %91 = vadd.xlane.f32.xlu1 %v90_v42 }
  0xa6   :  { %126 = vadd.xlane.f32.xlu1 %v114_v43 }
  0xc4   :  { %v122_v49 = vpop.xlane.xlu0 %121 }
  0xc5   :  { %v130_v51 = vmul.f32 0.00019607843, %v122_v49 }
 0x12b   :  { %v87_v45 = vpop.xlane.xlu1 %86 }
 0x12c   :  { %v93_v46 = vadd.f32 %v87_v45, %v81_v44 }
 0x12e   :  { %96 = vst.msk [vmem:[%s286_s2] sm:$0xff] %vm29_vm0, %v93_v46 }
 0x12f   :  { %v92_v48 = vpop.xlane.xlu1 %91 }
 0x130   :  { %v94_v50 = vadd.f32 %v92_v48, %v82_v47 }
 0x132   :  { %97 = vst.msk [vmem:[%s286_s2 + $0x8] sm:$0xff] %vm29_vm0, %v94_v50 }
 0x133   :  { %v127_v52 = vpop.xlane.xlu1 %126 }
 0x134   :  { %v131_v55 = vmul.f32 0.00019607843, %v127_v52 }
 0x135   :  { %v128_v53 = vld [vmem:[%s286_s2] sm:$0xff] }
 0x136   :  { %v132_v54 = vsub.f32 %v128_v53, %v130_v51 }
 0x138   :  { %134 = vst.msk [vmem:[%s286_s2] sm:$0xff] %vm29_vm0, %v132_v54 }
 0x139   :  { %v129_v56 = vld [vmem:[%s286_s2 + $0x8] sm:$0xff] }
 0x13a   :  { %v133_v57 = vsub.f32 %v129_v56, %v131_v55 }
 0x13c   :  { %135 = vst.msk [vmem:[%s286_s2 + $0x8] sm:$0xff] %vm29_vm0, %v133_v57 }
 0x13f   :  { %v141_v58 = vld [vmem:[%s286_s2] sm:$0xff] }
 0x140   :  { %v143_v59 = vsub.f32 -0.94852406, %v141_v58 }
 0x142   :  { %v145_v60 = vsel %vm139_vm10, %v143_v59, 0.0 }
 0x143   :  { %147 = vst.msk [vmem:[%s286_s2] sm:$0xff] %vm29_vm0, %v145_v60  ;;  %v142_v61 = vld [vmem:[%s286_s2 + $0x8] sm:$0xff] }
 0x144   :  { %v144_v62 = vsub.f32 -0.94852406, %v142_v61 }
 0x146   :  { %v146_v63 = vsel %vm140_vm11, %v144_v62, 0.0 }
 0x147   :  { %148 = vst.msk [vmem:[%s286_s2 + $0x8] sm:$0xff] %vm29_vm0, %v146_v63 }
 0x148   :  { %153 = vsyncpa [#allocation3], 1 }

</bundles_post_ra>
